<compile_context>
chip_gen: v6e
topology: v6e:2x2x1
jax: 0.10.0
libtpu: 0.0.40
codegen_flags: <defaults>
</compile_context>

<pallas_src>
import jax
import jax.numpy as jnp
from jax import lax
from jax.experimental import pallas as pl
from jax.experimental.pallas import tpu as pltpu


# --------------------------------------------------------------------------- #
# Kernel
# --------------------------------------------------------------------------- #
def _squeeze_kernel(w_ref, x_ref, o_ref):
    # w_ref: (E, K)   x_ref: (K, tn)   o_ref: (E, tn)
    o_ref[...] = jnp.dot(
        w_ref[...], x_ref[...], preferred_element_type=jnp.float32
    ).astype(o_ref.dtype)


# --------------------------------------------------------------------------- #
# Tiling / VMEM planning (generation aware)
# --------------------------------------------------------------------------- #
def _round_up(x, m):
    return -(-x // m) * m


def _vmem_capacity_bytes(default=64 << 20):
    """Physical VMEM per TensorCore; falls back to the v7x minimum (64 MiB)."""
    try:
        info = pltpu.get_tpu_info()
    except Exception:
        return default
    for attr in ("vmem_capacity_bytes", "vmem_bytes", "vmem_capacity"):
        val = getattr(info, attr, None)
        try:
            val = int(val)
        except (TypeError, ValueError):
            continue
        if val > 0:
            return val
    return default


def _vmem_plan(w_bytes):
    cap = _vmem_capacity_bytes()
    # Double-buffered in+out tile budget: ~30% of physical VMEM, capped at 48 MiB.
    tile_budget = int(min(max(cap * 3 // 10, 8 << 20), 48 << 20))
    # Scoped-VMEM limit: >= 32 MiB default, <= 75% of physical (v7x safe).
    vmem_limit = int(min(cap * 3 // 4,
                         max(32 << 20, tile_budget + 2 * w_bytes + (8 << 20))))
    return tile_budget, vmem_limit


def _choose_tiling(msp, k, e, in_itemsize, out_itemsize, tile_budget):
    """Pick (lane tile tn, padded M) such that:
       - tn is a multiple of 128 (lane-dense unmasked stores),
       - double-buffered (K,tn)+(E,tn) tiles fit tile_budget,
       - ~4 grid blocks per batch (pipeline overlap + both v7x TensorCores busy),
         while keeping tn >= 512 lanes when M allows it,
       - padded M is an exact multiple of tn (no ragged block, no VMEM-blowing
         full-extent fallback)."""
    m128 = _round_up(msp, 128)
    bytes_per_col = 2 * (k * in_itemsize + e * out_itemsize)     # double-buffered
    cap = max(128, (tile_budget // max(1, bytes_per_col)) // 128 * 128)

    want_blocks = 4                                              # per batch
    tn_pref = _round_up(pl.cdiv(m128, want_blocks), 128)
    tn = min(cap, m128, max(min(512, m128), tn_pref))
    tn = max(128, (tn // 128) * 128)

    # Prefer a tile that divides the 128-padded extent exactly (zero extra padding),
    # but never shrink below half the preferred tile.
    floor_div = max(128, (tn // 2 // 128) * 128)
    t = tn
    while t >= floor_div:
        if m128 % t == 0:
            return t, m128
        t -= 128
    return tn, _round_up(m128, tn)


# --------------------------------------------------------------------------- #
# pallas_call wrapper
# --------------------------------------------------------------------------- #
def _squeeze_matmul(w2d, x3d, *, out_dtype):
    """w2d: (E, K), x3d: (B, K, Msp)  ->  (B, E, Msp) via a Pallas MXU matmul."""
    B, K, Msp = x3d.shape
    E = w2d.shape[0]
    in_item = x3d.dtype.itemsize
    out_item = jnp.dtype(out_dtype).itemsize
    w_bytes = E * K * w2d.dtype.itemsize

    tile_budget, vmem_limit = _vmem_plan(w_bytes)
    tn, m_pad = _choose_tiling(Msp, K, E, in_item, out_item, tile_budget)
    if m_pad != Msp:
        x3d = jnp.pad(x3d, ((0, 0), (0, 0), (0, m_pad - Msp)))
    grid = (B, m_pad // tn)

    cost = pl.CostEstimate(
        flops=2 * B * E * K * m_pad,
        transcendentals=0,
        bytes_accessed=B * K * m_pad * in_item + w_bytes + B * E * m_pad * out_item,
    )

    out = pl.pallas_call(
        _squeeze_kernel,
        out_shape=jax.ShapeDtypeStruct((B, E, m_pad), out_dtype),
        grid_spec=pltpu.PrefetchScalarGridSpec(
            num_scalar_prefetch=0,
            grid=grid,
            in_specs=[
                # weight: tiny, constant across the grid -> stays VMEM-resident
                pl.BlockSpec((E, K), lambda b, m: (0, 0)),
                # activations: lane-dense (K, tn) slab per (batch, m-tile)
                pl.BlockSpec((pl.Squeezed(), K, tn), lambda b, m: (b, 0, m)),
            ],
            out_specs=pl.BlockSpec((pl.Squeezed(), E, tn), lambda b, m: (b, 0, m)),
        ),
        compiler_params=pltpu.CompilerParams(
            dimension_semantics=("parallel", "parallel"),
            vmem_limit_bytes=vmem_limit,
        ),
        cost_estimate=cost,
    )(w2d, x3d)

    if m_pad != Msp:
        out = out[:, :, :Msp]
    return out


# --------------------------------------------------------------------------- #
# Module
# --------------------------------------------------------------------------- #
class PatchMergingPallas:
    """JAX/Pallas equivalent of the PyTorch PatchMerging module (NCHW in/out)."""

    def __init__(self, in_dim, embedding_dim, input_resolution, stride, key,
                 compute_dtype=jnp.bfloat16, out_dtype=jnp.float32):
        self.H, self.W = input_resolution
        self.stride = stride
        self.in_dim = in_dim
        self.embedding_dim = embedding_dim
        self.compute_dtype = compute_dtype
        self.out_dtype = out_dtype            # pass jnp.bfloat16 if the consumer is bf16
        cin = in_dim * stride * stride
        # nn.Conv2d weight shape: (embedding_dim, cin, 1, 1), no bias.
        bound = 1.0 / jnp.sqrt(jnp.float32(cin))
        self.weight = jax.random.uniform(
            key, (embedding_dim, cin, 1, 1), jnp.float32, minval=-bound, maxval=bound
        )
        # Precompute the (E, cin) matmul weight once (no per-call transpose/cast).
        self.w2d = self.weight[:, :, 0, 0].astype(compute_dtype)

    def __call__(self, x):
        B, C, h, w = x.shape
        assert h == self.H and w == self.W, "INPUT SIZE WRONG"
        s = self.stride
        Ho, Wo = h // s, w // s
        cin = C * s * s

        # Pixel-unshuffle glue: one reshape + one transpose (single fused XLA pass),
        # matching the PyTorch `for i: for j: x[:, :, j::s, i::s]` concat order:
        #   x[b, c, ho*s + j, wo*s + i] -> xr[b, (i*s + j)*C + c, ho*Wo + wo]
        xr = x.astype(self.compute_dtype).reshape(B, C, Ho, s, Wo, s)
        xr = jnp.transpose(xr, (0, 5, 3, 1, 2, 4))           # (B, i, j, C, Ho, Wo)
        xr = xr.reshape(B, cin, Ho * Wo)                      # (B, K, M), M on lanes

        out3 = _squeeze_matmul(self.w2d, xr, out_dtype=self.out_dtype)  # (B, E, M)
        # Already channel-major: fold M back to (Ho, Wo). No output transpose.
        return out3.reshape(B, self.embedding_dim, Ho, Wo)


# --------------------------------------------------------------------------- #
# Pure-JAX reference (mirrors the PyTorch forward, with the same bf16 cast)
# --------------------------------------------------------------------------- #
def _reference(x, weight, stride, compute_dtype):
    s = stride
    xc = x.astype(compute_dtype).astype(jnp.float32)
    wc = weight.astype(compute_dtype).astype(jnp.float32)
    x_split = []
    for i in range(s):
        for j in range(s):
            x_split.append(xc[:, :, j::s, i::s])
    xcat = jnp.concatenate(x_split, axis=1)
    return lax.conv_general_dilated(
        xcat, wc, window_strides=(1, 1), padding="VALID",
        dimension_numbers=("NCHW", "OIHW", "NCHW"),
    )


if __name__ == "__main__":
    key = jax.random.PRNGKey(0)
    kx, kw = jax.random.split(key)

    B, C, H, W = 2, 4, 16, 16
    stride = 2
    embedding_dim = 32

    x = jax.random.normal(kx, (B, C, H, W), jnp.float32)

    module = PatchMergingPallas(
        in_dim=C,
        embedding_dim=embedding_dim,
        input_resolution=(H, W),
        stride=stride,
        key=kw,
    )

    fwd = jax.jit(module.__call__)
    out = jax.block_until_ready(fwd(x))

    ref = _reference(x, module.weight, stride, module.compute_dtype)
    assert out.shape == (B, embedding_dim, H // stride, W // stride), out.shape
    assert jnp.allclose(out, ref, atol=2e-3, rtol=2e-3), "mismatch vs reference"

    print("KERNEL_OK")
</pallas_src>

<mosaic_0001>
module attributes {stable_mosaic.version = 11 : i64} {
  func.func @_squeeze_kernel(%arg0: i32, %arg1: i32, %arg2: memref<32x16xbf16, #tpu.memory_space<vmem>>, %arg3: memref<1x16x128xbf16, #tpu.memory_space<vmem>>, %arg4: memref<1x32x128xf32, #tpu.memory_space<vmem>>) attributes {dimension_semantics = [#tpu.dimension_semantics<parallel>, #tpu.dimension_semantics<parallel>], iteration_bounds = array<i64: 2, 1>, scalar_prefetch = 0 : i64, scratch_operands = 0 : i64, tpu.core_type = #tpu.core_type<tc>, window_params = [{pipeline_mode = #tpu.pipeline_mode<synchronous>, transform_indices = @transform_0, window_bounds = array<i64: 32, 16>}, {transform_indices = @transform_1, window_bounds = array<i64: 1, 16, 128>}, {transform_indices = @transform_2, window_bounds = array<i64: 1, 32, 128>}]} {
    %c0 = arith.constant 0 : index
    %c0_0 = arith.constant 0 : index
    %0 = vector.load %arg2[%c0, %c0_0] : memref<32x16xbf16, #tpu.memory_space<vmem>>, vector<32x16xbf16>
    %c0_1 = arith.constant 0 : index
    %c0_2 = arith.constant 0 : index
    %c0_3 = arith.constant 0 : index
    %1 = vector.load %arg3[%c0_1, %c0_2, %c0_3] : memref<1x16x128xbf16, #tpu.memory_space<vmem>>, vector<1x16x128xbf16>
    %2 = vector.shape_cast %1 : vector<1x16x128xbf16> to vector<16x128xbf16>
    %cst = arith.constant dense<0.000000e+00> : vector<32x128xf32>
    %3 = tpu.matmul %0, %2, %cst {dimension_numbers = #tpu.dot_dimension_numbers<[1], [0], [0], [1], [0, 0, 1, 1], [], []>} : vector<32x16xbf16>, vector<16x128xbf16>, vector<32x128xf32> -> vector<32x128xf32>
    %c0_4 = arith.constant 0 : index
    %c0_5 = arith.constant 0 : index
    %c0_6 = arith.constant 0 : index
    %4 = vector.load %arg4[%c0_4, %c0_5, %c0_6] : memref<1x32x128xf32, #tpu.memory_space<vmem>>, vector<1x32x128xf32>
    %5 = vector.shape_cast %4 : vector<1x32x128xf32> to vector<32x128xf32>
    %6 = vector.shape_cast %3 : vector<32x128xf32> to vector<1x32x128xf32>
    tpu.vector_store %arg4[%c0_4, %c0_5, %c0_6], %6 {strides = array<i32>} : memref<1x32x128xf32, #tpu.memory_space<vmem>>, vector<1x32x128xf32>,
    return
  }
  func.func @transform_0(%arg0: i32, %arg1: i32) -> (i32, i32) {
    %c0_i32 = arith.constant 0 : i32
    %c0_i32_0 = arith.constant 0 : i32
    %c0_i32_1 = arith.constant 0 : i32
    return %c0_i32, %c0_i32_0 : i32, i32
  }
  func.func @transform_1(%arg0: i32, %arg1: i32) -> (i32, i32, i32) {
    %c0_i32 = arith.constant 0 : i32
    %c0_i32_0 = arith.constant 0 : i32
    return %arg0, %c0_i32, %arg1 : i32, i32, i32
  }
  func.func @transform_2(%arg0: i32, %arg1: i32) -> (i32, i32, i32) {
    %c0_i32 = arith.constant 0 : i32
    %c0_i32_0 = arith.constant 0 : i32
    return %arg0, %c0_i32, %arg1 : i32, i32, i32
  }
}

</mosaic_0001>

<bundles_post_ra>
// kernel: a_call__.1
= control target key start
LH: loop header
LB: loop body
LE: loop exit
PB: predicated region body
PF: predicated region fallthrough
CT: control target
= control target key end

     0   :  { %s434_s9 = smov 0   ;;  %s436_s10 = smov 0   ;;  %s470_s0 = inlined_call_operand.vmem [shape: bf16[32,16], index: 0, kind: input, shape index: {}]   ;;  %s471_s1 = inlined_call_operand.vmem [shape: bf16[2,16,128], index: 1, kind: input, shape index: {}]   ;;  %s472_s2 = inlined_call_operand.vmem [shape: f32[2,32,128], index: 2, kind: output, shape index: {}]  }
   0x1   :  { %s438_s11 = smov 0  }
   0x2 LB: > { %s24_s12 = sadd.s32 1, %s413_s10  ;;  %p345_p0 = scmp.ge.s32.totalorder %s417_s11, 1  ;;  %s417_s11 = sphi %s438_s11, %s12_s11   ;;  %s413_s10 = sphi %s436_s10, %s474_s10   ;;  %s409_s9 = sphi %s434_s9, %s473_s9  }
   0x3   : > { %p26_p1 = scmp.ge.s32.totalorder %s24_s12, 2  ;;  %p131_p2 = scmp.lt.s32.totalorder %s417_s11, 3 }
   0x5   : > { %s476_s12 = smov (%p26_p1, %s24_s12), 0  ;;  %p132_p3 = pnand %p345_p0, %p131_p2 }
   0x6   : > { %p159_p4 = scmp.lt.s32.totalorder (!%p132_p3), %s409_s9, 1 }
   0x7   : > { %135 = sbr.rel (%p132_p3) target bundleno = 220 (0xdc), region = 28 }
   0xc   : > { %v393_v0 = vld [vmem:[%s470_s0] sm:$0xff]   ;;  %vm198_vm0 = vcmask 130048   ;;  %s478_s9 = smov (!%p159_p4, %s409_s9), 1  ;;  %v394_v2 = vld [vmem:[%s470_s0 + $0x8] sm:$0xff]  }
   0xd   : > { %364 = vmatprep.mubr.msk.bf16.mxu0 %vm198_vm0, %v393_v0  ;;  %s357_s15 = sshll.u32 %s478_s9, 3  ;;  %s358_s21 = sshll.u32 %s478_s9, 5 }
   0xe   : > { %s166_s18 = scalar_lea.vmem %s471_s1, %s357_s15  ;;  %s174_s24 = scalar_lea.vmem %s472_s2, %s358_s21 }
   0xf   : > { %v392_v1 = vld [vmem:[%s166_s18] sm:$0xff]  }
  0x10   : > { %362 = vmatprep.subr.bf16.mxu0 %v392_v1 }
  0x11   : > { %363 = vmatpush3.bf16.msra.mxu0 %v392_v1 }
  0x14   : > { %365 = vmatmul.mubr.msk.bf16.vlgmr.msra.gmra.mxu0 %vm198_vm0, %v394_v2 }
  0xd4   : > { %v366_v3 = vpop.f32.mrf.mxu0 }
  0xd5   : > { %256 = vst [vmem:[%s174_s24 + $0x10] sm:$0xff] %v366_v3 }
  0xd6   : > { %v239_v4 = vpop.f32.mrf.mxu0 }
  0xd7   : > { %254 = vst [vmem:[%s174_s24] sm:$0xff] %v239_v4 }
  0xd8   : > { %v367_v5 = vpop.f32.mrf.mxu0 }
  0xd9   : > { %257 = vst [vmem:[%s174_s24 + $0x18] sm:$0xff] %v367_v5 }
  0xda   : > { %v242_v6 = vpop.f32.mrf.mxu0 }
  0xdb   : > { %255 = vst [vmem:[%s174_s24 + $0x8] sm:$0xff] %v242_v6 }
  0xdc PF: > { %s12_s11 = sadd.s32 1, %s417_s11   ;;  %s473_s9 = smov %s413_s10 }
  0xdd   : > { %p9_p5 = scmp.ge.s32.totalorder %s12_s11, 4   ;;  %s474_s10 = smov %s476_s12 }
  0xdf   :  { %11 = sbr.rel (!%p9_p5) target bundleno = 2 (0x2), region = 58 }

</bundles_post_ra>
